<compile_context>
chip_gen: v7x
topology: tpu7x:2x2x1
jax: 0.10.0
libtpu: 0.0.40
codegen_flags: <defaults>
</compile_context>

<pallas_src>
import jax
import jax.numpy as jnp
from jax.experimental import pallas as pl
from jax.experimental.pallas import tpu as pltpu


def _round_up(x, m):
  return (x + m - 1) // m * m


# ----------------------------------------------------------------------------
# Pallas kernel: obs2state + n_layers GRU cells (seq_len == 1) + fused Actor
# ----------------------------------------------------------------------------
def _finder_kernel(
    # inputs
    obs_ref, h0_ref,
    w_obs_ref, b_obs_ref,
    w_r_ref, w_z_ref, wi_n_ref, wh_n_ref,
    b_r_ref, b_z_ref, bi_n_ref, bh_n_ref,
    w_in_ref, b_in_ref, w_mlp_ref, b_mlp_ref,
    w_head_ref, b_head_ref,
    # outputs
    out_ref, h_out_ref,
):
  L = h0_ref.shape[0]
  bf16 = jnp.bfloat16

  # state = obs2state(obs)    (bf16 matmul, f32 accumulation)
  x = (
      jnp.dot(obs_ref[...].astype(bf16), w_obs_ref[...],
              preferred_element_type=jnp.float32)
      + b_obs_ref[...]
  )

  # memory = nn.GRU(n_hid, n_hid, n_layers), single timestep.
  # PyTorch GRU cell semantics (gate order r, z, n):
  #   r = sigmoid(Wir x + Whr h + b_r)     z = sigmoid(Wiz x + Whz h + b_z)
  #   n = tanh(Win x + bin + r*(Whn h + bhn))
  #   h' = (1 - z) * n + z * h
  # r/z use one fused [x|h] @ [Wih_g; Whh_g] dot each -> gate outputs are
  # lane-aligned at offset 0 (no lane-slicing of a fused 3H block).
  for l in range(L):
    h = h0_ref[l]
    x16 = x.astype(bf16)
    h16 = h.astype(bf16)
    xh = jnp.concatenate([x, h], axis=-1).astype(bf16)          # (TB, 2H)
    r = jax.nn.sigmoid(
        jnp.dot(xh, w_r_ref[l], preferred_element_type=jnp.float32)
        + b_r_ref[l])
    z = jax.nn.sigmoid(
        jnp.dot(xh, w_z_ref[l], preferred_element_type=jnp.float32)
        + b_z_ref[l])
    i_n = (jnp.dot(x16, wi_n_ref[l], preferred_element_type=jnp.float32)
           + bi_n_ref[l])
    hh_n = (jnp.dot(h16, wh_n_ref[l], preferred_element_type=jnp.float32)
            + bh_n_ref[l])
    n = jnp.tanh(i_n + r * hh_n)
    h_new = (1.0 - z) * n + z * h        # elementwise gate math stays f32
    h_out_ref[l] = h_new
    x = h_new                            # input to next GRU layer

  # Actor + value towers fused: hid = [act | val].  Hidden layers use
  # block-diagonal (2H, 2H) weights; the head is one lane-padded (2H, 128)
  # matmul producing the combined [logits | value | 0-pad] slab.
  hid = jnp.maximum(
      jnp.dot(x.astype(bf16), w_in_ref[...],
              preferred_element_type=jnp.float32) + b_in_ref[...], 0.0)
  for l in range(L):
    hid = jnp.maximum(
        jnp.dot(hid.astype(bf16), w_mlp_ref[l],
                preferred_element_type=jnp.float32) + b_mlp_ref[l], 0.0)
  out_ref[...] = (
      jnp.dot(hid.astype(bf16), w_head_ref[...],
              preferred_element_type=jnp.float32) + b_head_ref[...])


# ----------------------------------------------------------------------------
# Parameter fusion / bf16 cast (done once, outside the kernel)
# ----------------------------------------------------------------------------
def _prep_params(params, H, A, head_pad):
  wih = params["gru_wih"]   # (L, H, 3H), gate order r|z|n along columns
  whh = params["gru_whh"]   # (L, H, 3H)
  bih = params["gru_bih"]   # (L, 1, 3H)
  bhh = params["gru_bhh"]   # (L, 1, 3H)

  w_r = jnp.concatenate([wih[:, :, :H], whh[:, :, :H]], axis=1)       # (L,2H,H)
  w_z = jnp.concatenate([wih[:, :, H:2 * H], whh[:, :, H:2 * H]], axis=1)
  wi_n = wih[:, :, 2 * H:]                                            # (L,H,H)
  wh_n = whh[:, :, 2 * H:]                                            # (L,H,H)
  b_r = bih[:, :, :H] + bhh[:, :, :H]
  b_z = bih[:, :, H:2 * H] + bhh[:, :, H:2 * H]
  bi_n = bih[:, :, 2 * H:]
  bh_n = bhh[:, :, 2 * H:]

  # Fused actor/value tower.
  w_in = jnp.concatenate([params["wa_in"], params["wv_in"]], axis=1)  # (H,2H)
  b_in = jnp.concatenate([params["ba_in"], params["bv_in"]], axis=1)  # (1,2H)
  wa, wv = params["wa"], params["wv"]                                 # (L,H,H)
  zer = jnp.zeros_like(wa)
  w_mlp = jnp.concatenate(
      [jnp.concatenate([wa, zer], axis=2),
       jnp.concatenate([zer, wv], axis=2)], axis=1)                   # (L,2H,2H)
  b_mlp = jnp.concatenate([params["ba"], params["bv"]], axis=2)       # (L,1,2H)

  # Lane-padded fused head: columns [0,A) = logits, column A = value.
  w_head = jnp.zeros((2 * H, head_pad), jnp.float32)
  w_head = w_head.at[:H, :A].set(params["wa_out"])
  w_head = w_head.at[H:, A:A + 1].set(params["wv_out"])
  b_head = jnp.zeros((1, head_pad), jnp.float32)
  b_head = b_head.at[:, :A].set(params["ba_out"])
  b_head = b_head.at[:, A:A + 1].set(params["bv_out"])

  bf = lambda a: a.astype(jnp.bfloat16)
  f32 = lambda a: a.astype(jnp.float32)
  return (
      bf(params["w_obs"]), f32(params["b_obs"]),
      bf(w_r), bf(w_z), bf(wi_n), bf(wh_n),
      f32(b_r), f32(b_z), f32(bi_n), f32(bh_n),
      bf(w_in), f32(b_in), bf(w_mlp), f32(b_mlp),
      bf(w_head), f32(b_head),
  )


def _full_spec(a):
  nd = a.ndim
  return pl.BlockSpec(a.shape, lambda i, nd=nd: (0,) * nd)


# ----------------------------------------------------------------------------
# Wrapper
# ----------------------------------------------------------------------------
def finder_forward(loc_pred, rnn_hidden, params, *, batch_tile=128):
  """Pallas-backed equivalent of Finder.forward's post-localizer compute."""
  B = loc_pred.shape[0]
  obs = loc_pred.reshape(B, loc_pred.shape[1] * loc_pred.shape[2]).astype(
      jnp.float32)
  n_obs = obs.shape[1]
  L, _, H = rnn_hidden.shape
  A = params["wa_out"].shape[1]
  head_pad = _round_up(max(A + 1, 128), 128)

  weights = _prep_params(params, H, A, head_pad)

  # Pad batch to >= a sublane multiple; tile over batch so v7x's second
  # TensorCore participates (and pipelining kicks in at large B).
  TB = min(batch_tile, _round_up(B, 8))
  Bp = _round_up(B, TB)
  h0 = rnn_hidden.astype(jnp.float32)
  if Bp != B:
    obs = jnp.pad(obs, ((0, Bp - B), (0, 0)))
    h0 = jnp.pad(h0, ((0, 0), (0, Bp - B), (0, 0)))
  grid = (Bp // TB,)

  in_specs = [
      pl.BlockSpec((TB, n_obs), lambda i: (i, 0)),       # obs
      pl.BlockSpec((L, TB, H), lambda i: (0, i, 0)),     # rnn_hidden
  ] + [_full_spec(w) for w in weights]

  out_specs = (
      pl.BlockSpec((TB, head_pad), lambda i: (i, 0)),    # logits|value slab
      pl.BlockSpec((L, TB, H), lambda i: (0, i, 0)),     # new hidden state
  )

  slab, h_out = pl.pallas_call(
      _finder_kernel,
      grid=grid,
      in_specs=in_specs,
      out_specs=out_specs,
      out_shape=(
          jax.ShapeDtypeStruct((Bp, head_pad), jnp.float32),
          jax.ShapeDtypeStruct((L, Bp, H), jnp.float32),
      ),
      compiler_params=pltpu.CompilerParams(
          dimension_semantics=("parallel",)),
  )(obs, h0, *weights)

  return {
      "action_logits": slab[:B, :A],
      "state_values": slab[:B, A:A + 1],
      "loc_pred": loc_pred,
      "rnn_hidden": h_out[:, :B, :],
  }


# ----------------------------------------------------------------------------
# Deterministic parameter construction (mirrors the module __init__ shapes)
# ----------------------------------------------------------------------------
def _orthogonal(key, rows, cols):
  a = jax.random.normal(key, (max(rows, cols), min(rows, cols)), jnp.float32)
  q, _ = jnp.linalg.qr(a)
  q = q[:rows, :cols] if rows >= cols else q.T[:rows, :cols]
  return q


def make_params(key, n_obs, n_hid, n_layers, n_actions):
  ks = jax.random.split(key, 16)
  p = {}
  # obs2state: Linear(n_obs, n_hid)  -- stored as (in, out)
  p["w_obs"] = jax.random.normal(ks[0], (n_obs, n_hid), jnp.float32) * 0.05
  p["b_obs"] = jnp.zeros((1, n_hid), jnp.float32)
  # GRU: weights orthogonal, biases zero (as in Finder.__init__)
  wih, whh = [], []
  for l in range(n_layers):
    k1, k2 = jax.random.split(jax.random.fold_in(ks[1], l))
    wih.append(_orthogonal(k1, 3 * n_hid, n_hid).T)   # (H, 3H), x @ W
    whh.append(_orthogonal(k2, 3 * n_hid, n_hid).T)   # (H, 3H), h @ W
  p["gru_wih"] = jnp.stack(wih)
  p["gru_whh"] = jnp.stack(whh)
  p["gru_bih"] = jnp.zeros((n_layers, 1, 3 * n_hid), jnp.float32)
  p["gru_bhh"] = jnp.zeros((n_layers, 1, 3 * n_hid), jnp.float32)
  # Actor
  p["wa_in"] = jax.random.normal(ks[2], (n_hid, n_hid), jnp.float32) * 0.1
  p["ba_in"] = jax.random.normal(ks[3], (1, n_hid), jnp.float32) * 0.1
  p["wv_in"] = jax.random.normal(ks[4], (n_hid, n_hid), jnp.float32) * 0.1
  p["bv_in"] = jax.random.normal(ks[5], (1, n_hid), jnp.float32) * 0.1
  p["wa"] = jax.random.normal(ks[6], (n_layers, n_hid, n_hid), jnp.float32) * 0.1
  p["ba"] = jax.random.normal(ks[7], (n_layers, 1, n_hid), jnp.float32) * 0.1
  p["wv"] = jax.random.normal(ks[8], (n_layers, n_hid, n_hid), jnp.float32) * 0.1
  p["bv"] = jax.random.normal(ks[9], (n_layers, 1, n_hid), jnp.float32) * 0.1
  p["wa_out"] = jax.random.normal(ks[10], (n_hid, n_actions), jnp.float32) * 0.1
  p["ba_out"] = jnp.zeros((1, n_actions), jnp.float32)   # bias.fill_(0)
  p["wv_out"] = jax.random.normal(ks[11], (n_hid, 1), jnp.float32) * 0.1
  p["bv_out"] = jnp.zeros((1, 1), jnp.float32)            # bias.fill_(0)
  return p


# ----------------------------------------------------------------------------
# Pure-JAX f32 reference for correctness check (PyTorch semantics)
# ----------------------------------------------------------------------------
def finder_forward_ref(loc_pred, rnn_hidden, params):
  B = loc_pred.shape[0]
  obs = loc_pred.reshape(B, -1)
  L, _, H = rnn_hidden.shape
  x = obs @ params["w_obs"] + params["b_obs"]
  h_out = []
  for l in range(L):
    h = rnn_hidden[l]
    gi = x @ params["gru_wih"][l] + params["gru_bih"][l]
    gh = h @ params["gru_whh"][l] + params["gru_bhh"][l]
    r = jax.nn.sigmoid(gi[:, :H] + gh[:, :H])
    z = jax.nn.sigmoid(gi[:, H:2 * H] + gh[:, H:2 * H])
    n = jnp.tanh(gi[:, 2 * H:] + r * gh[:, 2 * H:])
    h_new = (1 - z) * n + z * h
    h_out.append(h_new)
    x = h_new
  act = jax.nn.relu(x @ params["wa_in"] + params["ba_in"])
  val = jax.nn.relu(x @ params["wv_in"] + params["bv_in"])
  for l in range(L):
    act = jax.nn.relu(act @ params["wa"][l] + params["ba"][l])
    val = jax.nn.relu(val @ params["wv"][l] + params["bv"][l])
  return (act @ params["wa_out"] + params["ba_out"],
          val @ params["wv_out"] + params["bv_out"],
          jnp.stack(h_out))


if __name__ == "__main__":
  B, Hh, Ww = 2, 8, 8          # loc_pred spatial map
  n_obs = Hh * Ww              # args.n_obs
  n_hid = 32                   # args.n_hid
  n_layers = 2                 # args.n_layers
  n_actions = 5

  key = jax.random.PRNGKey(0)
  k_loc, k_h, k_p = jax.random.split(key, 3)

  loc_pred = jax.random.normal(k_loc, (B, Hh, Ww), jnp.float32)
  rnn_hidden = jax.random.normal(k_h, (n_layers, B, n_hid), jnp.float32) * 0.1
  params = make_params(k_p, n_obs, n_hid, n_layers, n_actions)

  out = finder_forward(loc_pred, rnn_hidden, params)
  jax.block_until_ready(out)

  ref_logits, ref_values, ref_hidden = finder_forward_ref(
      loc_pred, rnn_hidden, params)
  # bf16 weights in the kernel -> looser tolerance vs. the pure-f32 reference.
  assert jnp.allclose(out["action_logits"], ref_logits, atol=5e-2, rtol=5e-2)
  assert jnp.allclose(out["state_values"], ref_values, atol=5e-2, rtol=5e-2)
  assert jnp.allclose(out["rnn_hidden"], ref_hidden, atol=5e-2, rtol=5e-2)
  assert out["action_logits"].shape == (B, n_actions)
  assert out["state_values"].shape == (B, 1)
  assert out["rnn_hidden"].shape == (n_layers, B, n_hid)

  print("KERNEL_OK")
</pallas_src>

<mosaic_0001>
module attributes {stable_mosaic.version = 11 : i64} {
  func.func @_finder_kernel(%arg0: i32, %arg1: memref<8x64xf32, #tpu.memory_space<vmem>>, %arg2: memref<2x8x32xf32, #tpu.memory_space<vmem>>, %arg3: memref<64x32xbf16, #tpu.memory_space<vmem>>, %arg4: memref<1x32xf32, #tpu.memory_space<vmem>>, %arg5: memref<2x64x32xbf16, #tpu.memory_space<vmem>>, %arg6: memref<2x64x32xbf16, #tpu.memory_space<vmem>>, %arg7: memref<2x32x32xbf16, #tpu.memory_space<vmem>>, %arg8: memref<2x32x32xbf16, #tpu.memory_space<vmem>>, %arg9: memref<2x1x32xf32, #tpu.memory_space<vmem>>, %arg10: memref<2x1x32xf32, #tpu.memory_space<vmem>>, %arg11: memref<2x1x32xf32, #tpu.memory_space<vmem>>, %arg12: memref<2x1x32xf32, #tpu.memory_space<vmem>>, %arg13: memref<32x64xbf16, #tpu.memory_space<vmem>>, %arg14: memref<1x64xf32, #tpu.memory_space<vmem>>, %arg15: memref<2x64x64xbf16, #tpu.memory_space<vmem>>, %arg16: memref<2x1x64xf32, #tpu.memory_space<vmem>>, %arg17: memref<64x128xbf16, #tpu.memory_space<vmem>>, %arg18: memref<1x128xf32, #tpu.memory_space<vmem>>, %arg19: memref<8x128xf32, #tpu.memory_space<vmem>>, %arg20: memref<2x8x32xf32, #tpu.memory_space<vmem>>) attributes {dimension_semantics = [#tpu.dimension_semantics<parallel>], iteration_bounds = array<i64: 1>, scalar_prefetch = 0 : i64, scratch_operands = 0 : i64, tpu.core_type = #tpu.core_type<tc>, window_params = [{transform_indices = @transform_0, window_bounds = array<i64: 8, 64>}, {transform_indices = @transform_1, window_bounds = array<i64: 2, 8, 32>}, {pipeline_mode = #tpu.pipeline_mode<synchronous>, transform_indices = @transform_2, window_bounds = array<i64: 64, 32>}, {pipeline_mode = #tpu.pipeline_mode<synchronous>, transform_indices = @transform_3, window_bounds = array<i64: 1, 32>}, {pipeline_mode = #tpu.pipeline_mode<synchronous>, transform_indices = @transform_4, window_bounds = array<i64: 2, 64, 32>}, {pipeline_mode = #tpu.pipeline_mode<synchronous>, transform_indices = @transform_5, window_bounds = array<i64: 2, 64, 32>}, {pipeline_mode = #tpu.pipeline_mode<synchronous>, transform_indices = @transform_6, window_bounds = array<i64: 2, 32, 32>}, {pipeline_mode = #tpu.pipeline_mode<synchronous>, transform_indices = @transform_7, window_bounds = array<i64: 2, 32, 32>}, {pipeline_mode = #tpu.pipeline_mode<synchronous>, transform_indices = @transform_8, window_bounds = array<i64: 2, 1, 32>}, {pipeline_mode = #tpu.pipeline_mode<synchronous>, transform_indices = @transform_9, window_bounds = array<i64: 2, 1, 32>}, {pipeline_mode = #tpu.pipeline_mode<synchronous>, transform_indices = @transform_10, window_bounds = array<i64: 2, 1, 32>}, {pipeline_mode = #tpu.pipeline_mode<synchronous>, transform_indices = @transform_11, window_bounds = array<i64: 2, 1, 32>}, {pipeline_mode = #tpu.pipeline_mode<synchronous>, transform_indices = @transform_12, window_bounds = array<i64: 32, 64>}, {pipeline_mode = #tpu.pipeline_mode<synchronous>, transform_indices = @transform_13, window_bounds = array<i64: 1, 64>}, {pipeline_mode = #tpu.pipeline_mode<synchronous>, transform_indices = @transform_14, window_bounds = array<i64: 2, 64, 64>}, {pipeline_mode = #tpu.pipeline_mode<synchronous>, transform_indices = @transform_15, window_bounds = array<i64: 2, 1, 64>}, {pipeline_mode = #tpu.pipeline_mode<synchronous>, transform_indices = @transform_16, window_bounds = array<i64: 64, 128>}, {pipeline_mode = #tpu.pipeline_mode<synchronous>, transform_indices = @transform_17, window_bounds = array<i64: 1, 128>}, {transform_indices = @transform_18, window_bounds = array<i64: 8, 128>}, {transform_indices = @transform_19, window_bounds = array<i64: 2, 8, 32>}]} {
    %c0 = arith.constant 0 : index
    %c0_0 = arith.constant 0 : index
    %0 = vector.load %arg1[%c0, %c0_0] : memref<8x64xf32, #tpu.memory_space<vmem>>, vector<8x64xf32>
    %1 = arith.truncf %0 : vector<8x64xf32> to vector<8x64xbf16>
    %c0_1 = arith.constant 0 : index
    %c0_2 = arith.constant 0 : index
    %2 = vector.load %arg3[%c0_1, %c0_2] : memref<64x32xbf16, #tpu.memory_space<vmem>>, vector<64x32xbf16>
    %cst = arith.constant dense<0.000000e+00> : vector<8x32xf32>
    %3 = tpu.matmul %1, %2, %cst {dimension_numbers = #tpu.dot_dimension_numbers<[1], [0], [0], [1], [0, 0, 1, 1], [], []>} : vector<8x64xbf16>, vector<64x32xbf16>, vector<8x32xf32> -> vector<8x32xf32>
    %c0_3 = arith.constant 0 : index
    %c0_4 = arith.constant 0 : index
    %4 = vector.load %arg4[%c0_3, %c0_4] : memref<1x32xf32, #tpu.memory_space<vmem>>, vector<1x32xf32>
    %5 = vector.broadcast %4 : vector<1x32xf32> to vector<8x32xf32>
    %6 = arith.addf %3, %5 : vector<8x32xf32>
    %c0_5 = arith.constant 0 : index
    %c0_6 = arith.constant 0 : index
    %c0_7 = arith.constant 0 : index
    %7 = vector.load %arg2[%c0_5, %c0_6, %c0_7] : memref<2x8x32xf32, #tpu.memory_space<vmem>>, vector<1x8x32xf32>
    %8 = vector.shape_cast %7 : vector<1x8x32xf32> to vector<8x32xf32>
    %9 = arith.truncf %6 : vector<8x32xf32> to vector<8x32xbf16>
    %10 = arith.truncf %8 : vector<8x32xf32> to vector<8x32xbf16>
    %11 = tpu.concatenate %6, %8 in 1 : vector<8x32xf32>, vector<8x32xf32> -> vector<8x64xf32>
    %12 = arith.truncf %11 : vector<8x64xf32> to vector<8x64xbf16>
    %c0_8 = arith.constant 0 : index
    %c0_9 = arith.constant 0 : index
    %c0_10 = arith.constant 0 : index
    %13 = vector.load %arg5[%c0_8, %c0_9, %c0_10] : memref<2x64x32xbf16, #tpu.memory_space<vmem>>, vector<1x64x32xbf16>
    %14 = vector.shape_cast %13 : vector<1x64x32xbf16> to vector<64x32xbf16>
    %cst_11 = arith.constant dense<0.000000e+00> : vector<8x32xf32>
    %15 = tpu.matmul %12, %14, %cst_11 {dimension_numbers = #tpu.dot_dimension_numbers<[1], [0], [0], [1], [0, 0, 1, 1], [], []>} : vector<8x64xbf16>, vector<64x32xbf16>, vector<8x32xf32> -> vector<8x32xf32>
    %c0_12 = arith.constant 0 : index
    %c0_13 = arith.constant 0 : index
    %c0_14 = arith.constant 0 : index
    %16 = vector.load %arg9[%c0_12, %c0_13, %c0_14] : memref<2x1x32xf32, #tpu.memory_space<vmem>>, vector<1x1x32xf32>
    %17 = vector.shape_cast %16 : vector<1x1x32xf32> to vector<1x32xf32>
    %18 = vector.broadcast %17 : vector<1x32xf32> to vector<8x32xf32>
    %19 = arith.addf %15, %18 : vector<8x32xf32>
    %20 = arith.negf %19 : vector<8x32xf32>
    %21 = math.exp %20 : vector<8x32xf32>
    %cst_15 = arith.constant 1.000000e+00 : f32
    %22 = vector.broadcast %cst_15 : f32 to vector<8x32xf32>
    %23 = arith.addf %22, %21 : vector<8x32xf32>
    %24 = arith.divf %22, %23 : vector<8x32xf32>
    %c0_16 = arith.constant 0 : index
    %c0_17 = arith.constant 0 : index
    %c0_18 = arith.constant 0 : index
    %25 = vector.load %arg6[%c0_16, %c0_17, %c0_18] : memref<2x64x32xbf16, #tpu.memory_space<vmem>>, vector<1x64x32xbf16>
    %26 = vector.shape_cast %25 : vector<1x64x32xbf16> to vector<64x32xbf16>
    %cst_19 = arith.constant dense<0.000000e+00> : vector<8x32xf32>
    %27 = tpu.matmul %12, %26, %cst_19 {dimension_numbers = #tpu.dot_dimension_numbers<[1], [0], [0], [1], [0, 0, 1, 1], [], []>} : vector<8x64xbf16>, vector<64x32xbf16>, vector<8x32xf32> -> vector<8x32xf32>
    %c0_20 = arith.constant 0 : index
    %c0_21 = arith.constant 0 : index
    %c0_22 = arith.constant 0 : index
    %28 = vector.load %arg10[%c0_20, %c0_21, %c0_22] : memref<2x1x32xf32, #tpu.memory_space<vmem>>, vector<1x1x32xf32>
    %29 = vector.shape_cast %28 : vector<1x1x32xf32> to vector<1x32xf32>
    %30 = vector.broadcast %29 : vector<1x32xf32> to vector<8x32xf32>
    %31 = arith.addf %27, %30 : vector<8x32xf32>
    %32 = arith.negf %31 : vector<8x32xf32>
    %33 = math.exp %32 : vector<8x32xf32>
    %cst_23 = arith.constant 1.000000e+00 : f32
    %34 = vector.broadcast %cst_23 : f32 to vector<8x32xf32>
    %35 = arith.addf %34, %33 : vector<8x32xf32>
    %36 = arith.divf %34, %35 : vector<8x32xf32>
    %c0_24 = arith.constant 0 : index
    %c0_25 = arith.constant 0 : index
    %c0_26 = arith.constant 0 : index
    %37 = vector.load %arg7[%c0_24, %c0_25, %c0_26] : memref<2x32x32xbf16, #tpu.memory_space<vmem>>, vector<1x32x32xbf16>
    %38 = vector.shape_cast %37 : vector<1x32x32xbf16> to vector<32x32xbf16>
    %cst_27 = arith.constant dense<0.000000e+00> : vector<8x32xf32>
    %39 = tpu.matmul %9, %38, %cst_27 {dimension_numbers = #tpu.dot_dimension_numbers<[1], [0], [0], [1], [0, 0, 1, 1], [], []>} : vector<8x32xbf16>, vector<32x32xbf16>, vector<8x32xf32> -> vector<8x32xf32>
    %c0_28 = arith.constant 0 : index
    %c0_29 = arith.constant 0 : index
    %c0_30 = arith.constant 0 : index
    %40 = vector.load %arg11[%c0_28, %c0_29, %c0_30] : memref<2x1x32xf32, #tpu.memory_space<vmem>>, vector<1x1x32xf32>
    %41 = vector.shape_cast %40 : vector<1x1x32xf32> to vector<1x32xf32>
    %42 = vector.broadcast %41 : vector<1x32xf32> to vector<8x32xf32>
    %43 = arith.addf %39, %42 : vector<8x32xf32>
    %c0_31 = arith.constant 0 : index
    %c0_32 = arith.constant 0 : index
    %c0_33 = arith.constant 0 : index
    %44 = vector.load %arg8[%c0_31, %c0_32, %c0_33] : memref<2x32x32xbf16, #tpu.memory_space<vmem>>, vector<1x32x32xbf16>
    %45 = vector.shape_cast %44 : vector<1x32x32xbf16> to vector<32x32xbf16>
    %cst_34 = arith.constant dense<0.000000e+00> : vector<8x32xf32>
    %46 = tpu.matmul %10, %45, %cst_34 {dimension_numbers = #tpu.dot_dimension_numbers<[1], [0], [0], [1], [0, 0, 1, 1], [], []>} : vector<8x32xbf16>, vector<32x32xbf16>, vector<8x32xf32> -> vector<8x32xf32>
    %c0_35 = arith.constant 0 : index
    %c0_36 = arith.constant 0 : index
    %c0_37 = arith.constant 0 : index
    %47 = vector.load %arg12[%c0_35, %c0_36, %c0_37] : memref<2x1x32xf32, #tpu.memory_space<vmem>>, vector<1x1x32xf32>
    %48 = vector.shape_cast %47 : vector<1x1x32xf32> to vector<1x32xf32>
    %49 = vector.broadcast %48 : vector<1x32xf32> to vector<8x32xf32>
    %50 = arith.addf %46, %49 : vector<8x32xf32>
    %51 = arith.mulf %24, %50 : vector<8x32xf32>
    %52 = arith.addf %43, %51 : vector<8x32xf32>
    %53 = math.tanh %52 : vector<8x32xf32>
    %cst_38 = arith.constant 1.000000e+00 : f32
    %54 = vector.broadcast %cst_38 : f32 to vector<8x32xf32>
    %55 = arith.subf %54, %36 : vector<8x32xf32>
    %56 = arith.mulf %55, %53 : vector<8x32xf32>
    %57 = arith.mulf %36, %8 : vector<8x32xf32>
    %58 = arith.addf %56, %57 : vector<8x32xf32>
    %c0_39 = arith.constant 0 : index
    %c0_40 = arith.constant 0 : index
    %c0_41 = arith.constant 0 : index
    %59 = vector.load %arg20[%c0_39, %c0_40, %c0_41] : memref<2x8x32xf32, #tpu.memory_space<vmem>>, vector<1x8x32xf32>
    %60 = vector.shape_cast %59 : vector<1x8x32xf32> to vector<8x32xf32>
    %61 = vector.shape_cast %58 : vector<8x32xf32> to vector<1x8x32xf32>
    tpu.vector_store %arg20[%c0_39, %c0_40, %c0_41], %61 {strides = array<i32>} : memref<2x8x32xf32, #tpu.memory_space<vmem>>, vector<1x8x32xf32>,
    %c1 = arith.constant 1 : index
    %c0_42 = arith.constant 0 : index
    %c0_43 = arith.constant 0 : index
    %62 = vector.load %arg2[%c1, %c0_42, %c0_43] : memref<2x8x32xf32, #tpu.memory_space<vmem>>, vector<1x8x32xf32>
    %63 = vector.shape_cast %62 : vector<1x8x32xf32> to vector<8x32xf32>
    %64 = arith.truncf %58 : vector<8x32xf32> to vector<8x32xbf16>
    %65 = arith.truncf %63 : vector<8x32xf32> to vector<8x32xbf16>
    %66 = tpu.concatenate %58, %63 in 1 : vector<8x32xf32>, vector<8x32xf32> -> vector<8x64xf32>
    %67 = arith.truncf %66 : vector<8x64xf32> to vector<8x64xbf16>
    %c1_44 = arith.constant 1 : index
    %c0_45 = arith.constant 0 : index
    %c0_46 = arith.constant 0 : index
    %68 = vector.load %arg5[%c1_44, %c0_45, %c0_46] : memref<2x64x32xbf16, #tpu.memory_space<vmem>>, vector<1x64x32xbf16>
    %69 = vector.shape_cast %68 : vector<1x64x32xbf16> to vector<64x32xbf16>
    %cst_47 = arith.constant dense<0.000000e+00> : vector<8x32xf32>
    %70 = tpu.matmul %67, %69, %cst_47 {dimension_numbers = #tpu.dot_dimension_numbers<[1], [0], [0], [1], [0, 0, 1, 1], [], []>} : vector<8x64xbf16>, vector<64x32xbf16>, vector<8x32xf32> -> vector<8x32xf32>
    %c1_48 = arith.constant 1 : index
    %c0_49 = arith.constant 0 : index
    %c0_50 = arith.constant 0 : index
    %71 = vector.load %arg9[%c1_48, %c0_49, %c0_50] : memref<2x1x32xf32, #tpu.memory_space<vmem>>, vector<1x1x32xf32>
    %72 = vector.shape_cast %71 : vector<1x1x32xf32> to vector<1x32xf32>
    %73 = vector.broadcast %72 : vector<1x32xf32> to vector<8x32xf32>
    %74 = arith.addf %70, %73 : vector<8x32xf32>
    %75 = arith.negf %74 : vector<8x32xf32>
    %76 = math.exp %75 : vector<8x32xf32>
    %cst_51 = arith.constant 1.000000e+00 : f32
    %77 = vector.broadcast %cst_51 : f32 to vector<8x32xf32>
    %78 = arith.addf %77, %76 : vector<8x32xf32>
    %79 = arith.divf %77, %78 : vector<8x32xf32>
    %c1_52 = arith.constant 1 : index
    %c0_53 = arith.constant 0 : index
    %c0_54 = arith.constant 0 : index
    %80 = vector.load %arg6[%c1_52, %c0_53, %c0_54] : memref<2x64x32xbf16, #tpu.memory_space<vmem>>, vector<1x64x32xbf16>
    %81 = vector.shape_cast %80 : vector<1x64x32xbf16> to vector<64x32xbf16>
    %cst_55 = arith.constant dense<0.000000e+00> : vector<8x32xf32>
    %82 = tpu.matmul %67, %81, %cst_55 {dimension_numbers = #tpu.dot_dimension_numbers<[1], [0], [0], [1], [0, 0, 1, 1], [], []>} : vector<8x64xbf16>, vector<64x32xbf16>, vector<8x32xf32> -> vector<8x32xf32>
    %c1_56 = arith.constant 1 : index
    %c0_57 = arith.constant 0 : index
    %c0_58 = arith.constant 0 : index
    %83 = vector.load %arg10[%c1_56, %c0_57, %c0_58] : memref<2x1x32xf32, #tpu.memory_space<vmem>>, vector<1x1x32xf32>
    %84 = vector.shape_cast %83 : vector<1x1x32xf32> to vector<1x32xf32>
    %85 = vector.broadcast %84 : vector<1x32xf32> to vector<8x32xf32>
    %86 = arith.addf %82, %85 : vector<8x32xf32>
    %87 = arith.negf %86 : vector<8x32xf32>
    %88 = math.exp %87 : vector<8x32xf32>
    %cst_59 = arith.constant 1.000000e+00 : f32
    %89 = vector.broadcast %cst_59 : f32 to vector<8x32xf32>
    %90 = arith.addf %89, %88 : vector<8x32xf32>
    %91 = arith.divf %89, %90 : vector<8x32xf32>
    %c1_60 = arith.constant 1 : index
    %c0_61 = arith.constant 0 : index
    %c0_62 = arith.constant 0 : index
    %92 = vector.load %arg7[%c1_60, %c0_61, %c0_62] : memref<2x32x32xbf16, #tpu.memory_space<vmem>>, vector<1x32x32xbf16>
    %93 = vector.shape_cast %92 : vector<1x32x32xbf16> to vector<32x32xbf16>
    %cst_63 = arith.constant dense<0.000000e+00> : vector<8x32xf32>
    %94 = tpu.matmul %64, %93, %cst_63 {dimension_numbers = #tpu.dot_dimension_numbers<[1], [0], [0], [1], [0, 0, 1, 1], [], []>} : vector<8x32xbf16>, vector<32x32xbf16>, vector<8x32xf32> -> vector<8x32xf32>
    %c1_64 = arith.constant 1 : index
    %c0_65 = arith.constant 0 : index
    %c0_66 = arith.constant 0 : index
    %95 = vector.load %arg11[%c1_64, %c0_65, %c0_66] : memref<2x1x32xf32, #tpu.memory_space<vmem>>, vector<1x1x32xf32>
    %96 = vector.shape_cast %95 : vector<1x1x32xf32> to vector<1x32xf32>
    %97 = vector.broadcast %96 : vector<1x32xf32> to vector<8x32xf32>
    %98 = arith.addf %94, %97 : vector<8x32xf32>
    %c1_67 = arith.constant 1 : index
    %c0_68 = arith.constant 0 : index
    %c0_69 = arith.constant 0 : index
    %99 = vector.load %arg8[%c1_67, %c0_68, %c0_69] : memref<2x32x32xbf16, #tpu.memory_space<vmem>>, vector<1x32x32xbf16>
    %100 = vector.shape_cast %99 : vector<1x32x32xbf16> to vector<32x32xbf16>
    %cst_70 = arith.constant dense<0.000000e+00> : vector<8x32xf32>
    %101 = tpu.matmul %65, %100, %cst_70 {dimension_numbers = #tpu.dot_dimension_numbers<[1], [0], [0], [1], [0, 0, 1, 1], [], []>} : vector<8x32xbf16>, vector<32x32xbf16>, vector<8x32xf32> -> vector<8x32xf32>
    %c1_71 = arith.constant 1 : index
    %c0_72 = arith.constant 0 : index
    %c0_73 = arith.constant 0 : index
    %102 = vector.load %arg12[%c1_71, %c0_72, %c0_73] : memref<2x1x32xf32, #tpu.memory_space<vmem>>, vector<1x1x32xf32>
    %103 = vector.shape_cast %102 : vector<1x1x32xf32> to vector<1x32xf32>
    %104 = vector.broadcast %103 : vector<1x32xf32> to vector<8x32xf32>
    %105 = arith.addf %101, %104 : vector<8x32xf32>
    %106 = arith.mulf %79, %105 : vector<8x32xf32>
    %107 = arith.addf %98, %106 : vector<8x32xf32>
    %108 = math.tanh %107 : vector<8x32xf32>
    %cst_74 = arith.constant 1.000000e+00 : f32
    %109 = vector.broadcast %cst_74 : f32 to vector<8x32xf32>
    %110 = arith.subf %109, %91 : vector<8x32xf32>
    %111 = arith.mulf %110, %108 : vector<8x32xf32>
    %112 = arith.mulf %91, %63 : vector<8x32xf32>
    %113 = arith.addf %111, %112 : vector<8x32xf32>
    %c1_75 = arith.constant 1 : index
    %c0_76 = arith.constant 0 : index
    %c0_77 = arith.constant 0 : index
    %114 = vector.load %arg20[%c1_75, %c0_76, %c0_77] : memref<2x8x32xf32, #tpu.memory_space<vmem>>, vector<1x8x32xf32>
    %115 = vector.shape_cast %114 : vector<1x8x32xf32> to vector<8x32xf32>
    %116 = vector.shape_cast %113 : vector<8x32xf32> to vector<1x8x32xf32>
    tpu.vector_store %arg20[%c1_75, %c0_76, %c0_77], %116 {strides = array<i32>} : memref<2x8x32xf32, #tpu.memory_space<vmem>>, vector<1x8x32xf32>,
    %117 = arith.truncf %113 : vector<8x32xf32> to vector<8x32xbf16>
    %c0_78 = arith.constant 0 : index
    %c0_79 = arith.constant 0 : index
    %118 = vector.load %arg13[%c0_78, %c0_79] : memref<32x64xbf16, #tpu.memory_space<vmem>>, vector<32x64xbf16>
    %cst_80 = arith.constant dense<0.000000e+00> : vector<8x64xf32>
    %119 = tpu.matmul %117, %118, %cst_80 {dimension_numbers = #tpu.dot_dimension_numbers<[1], [0], [0], [1], [0, 0, 1, 1], [], []>} : vector<8x32xbf16>, vector<32x64xbf16>, vector<8x64xf32> -> vector<8x64xf32>
    %c0_81 = arith.constant 0 : index
    %c0_82 = arith.constant 0 : index
    %120 = vector.load %arg14[%c0_81, %c0_82] : memref<1x64xf32, #tpu.memory_space<vmem>>, vector<1x64xf32>
    %121 = vector.broadcast %120 : vector<1x64xf32> to vector<8x64xf32>
    %122 = arith.addf %119, %121 : vector<8x64xf32>
    %cst_83 = arith.constant 0.000000e+00 : f32
    %123 = vector.broadcast %cst_83 : f32 to vector<8x64xf32>
    %124 = arith.maximumf %122, %123 : vector<8x64xf32>
    %125 = arith.truncf %124 : vector<8x64xf32> to vector<8x64xbf16>
    %c0_84 = arith.constant 0 : index
    %c0_85 = arith.constant 0 : index
    %c0_86 = arith.constant 0 : index
    %126 = vector.load %arg15[%c0_84, %c0_85, %c0_86] : memref<2x64x64xbf16, #tpu.memory_space<vmem>>, vector<1x64x64xbf16>
    %127 = vector.shape_cast %126 : vector<1x64x64xbf16> to vector<64x64xbf16>
    %cst_87 = arith.constant dense<0.000000e+00> : vector<8x64xf32>
    %128 = tpu.matmul %125, %127, %cst_87 {dimension_numbers = #tpu.dot_dimension_numbers<[1], [0], [0], [1], [0, 0, 1, 1], [], []>} : vector<8x64xbf16>, vector<64x64xbf16>, vector<8x64xf32> -> vector<8x64xf32>
    %c0_88 = arith.constant 0 : index
    %c0_89 = arith.constant 0 : index
    %c0_90 = arith.constant 0 : index
    %129 = vector.load %arg16[%c0_88, %c0_89, %c0_90] : memref<2x1x64xf32, #tpu.memory_space<vmem>>, vector<1x1x64xf32>
    %130 = vector.shape_cast %129 : vector<1x1x64xf32> to vector<1x64xf32>
    %131 = vector.broadcast %130 : vector<1x64xf32> to vector<8x64xf32>
    %132 = arith.addf %128, %131 : vector<8x64xf32>
    %cst_91 = arith.constant 0.000000e+00 : f32
    %133 = vector.broadcast %cst_91 : f32 to vector<8x64xf32>
    %134 = arith.maximumf %132, %133 : vector<8x64xf32>
    %135 = arith.truncf %134 : vector<8x64xf32> to vector<8x64xbf16>
    %c1_92 = arith.constant 1 : index
    %c0_93 = arith.constant 0 : index
    %c0_94 = arith.constant 0 : index
    %136 = vector.load %arg15[%c1_92, %c0_93, %c0_94] : memref<2x64x64xbf16, #tpu.memory_space<vmem>>, vector<1x64x64xbf16>
    %137 = vector.shape_cast %136 : vector<1x64x64xbf16> to vector<64x64xbf16>
    %cst_95 = arith.constant dense<0.000000e+00> : vector<8x64xf32>
    %138 = tpu.matmul %135, %137, %cst_95 {dimension_numbers = #tpu.dot_dimension_numbers<[1], [0], [0], [1], [0, 0, 1, 1], [], []>} : vector<8x64xbf16>, vector<64x64xbf16>, vector<8x64xf32> -> vector<8x64xf32>
    %c1_96 = arith.constant 1 : index
    %c0_97 = arith.constant 0 : index
    %c0_98 = arith.constant 0 : index
    %139 = vector.load %arg16[%c1_96, %c0_97, %c0_98] : memref<2x1x64xf32, #tpu.memory_space<vmem>>, vector<1x1x64xf32>
    %140 = vector.shape_cast %139 : vector<1x1x64xf32> to vector<1x64xf32>
    %141 = vector.broadcast %140 : vector<1x64xf32> to vector<8x64xf32>
    %142 = arith.addf %138, %141 : vector<8x64xf32>
    %cst_99 = arith.constant 0.000000e+00 : f32
    %143 = vector.broadcast %cst_99 : f32 to vector<8x64xf32>
    %144 = arith.maximumf %142, %143 : vector<8x64xf32>
    %145 = arith.truncf %144 : vector<8x64xf32> to vector<8x64xbf16>
    %c0_100 = arith.constant 0 : index
    %c0_101 = arith.constant 0 : index
    %146 = vector.load %arg17[%c0_100, %c0_101] : memref<64x128xbf16, #tpu.memory_space<vmem>>, vector<64x128xbf16>
    %cst_102 = arith.constant dense<0.000000e+00> : vector<8x128xf32>
    %147 = tpu.matmul %145, %146, %cst_102 {dimension_numbers = #tpu.dot_dimension_numbers<[1], [0], [0], [1], [0, 0, 1, 1], [], []>} : vector<8x64xbf16>, vector<64x128xbf16>, vector<8x128xf32> -> vector<8x128xf32>
    %c0_103 = arith.constant 0 : index
    %c0_104 = arith.constant 0 : index
    %148 = vector.load %arg18[%c0_103, %c0_104] : memref<1x128xf32, #tpu.memory_space<vmem>>, vector<1x128xf32>
    %149 = vector.broadcast %148 : vector<1x128xf32> to vector<8x128xf32>
    %150 = arith.addf %147, %149 : vector<8x128xf32>
    %c0_105 = arith.constant 0 : index
    %c0_106 = arith.constant 0 : index
    %151 = vector.load %arg19[%c0_105, %c0_106] : memref<8x128xf32, #tpu.memory_space<vmem>>, vector<8x128xf32>
    tpu.vector_store %arg19[%c0_105, %c0_106], %150 {strides = array<i32>} : memref<8x128xf32, #tpu.memory_space<vmem>>, vector<8x128xf32>,
    return
  }
  func.func @transform_0(%arg0: i32) -> (i32, i32) {
    %c0_i32 = arith.constant 0 : i32
    %c0_i32_0 = arith.constant 0 : i32
    return %arg0, %c0_i32 : i32, i32
  }
  func.func @transform_1(%arg0: i32) -> (i32, i32, i32) {
    %c0_i32 = arith.constant 0 : i32
    %c0_i32_0 = arith.constant 0 : i32
    %c0_i32_1 = arith.constant 0 : i32
    return %c0_i32, %arg0, %c0_i32_0 : i32, i32, i32
  }
  func.func @transform_2(%arg0: i32) -> (i32, i32) {
    %c0_i32 = arith.constant 0 : i32
    %c0_i32_0 = arith.constant 0 : i32
    %c0_i32_1 = arith.constant 0 : i32
    return %c0_i32, %c0_i32_0 : i32, i32
  }
  func.func @transform_3(%arg0: i32) -> (i32, i32) {
    %c0_i32 = arith.constant 0 : i32
    %c0_i32_0 = arith.constant 0 : i32
    %c0_i32_1 = arith.constant 0 : i32
    return %c0_i32, %c0_i32_0 : i32, i32
  }
  func.func @transform_4(%arg0: i32) -> (i32, i32, i32) {
    %c0_i32 = arith.constant 0 : i32
    %c0_i32_0 = arith.constant 0 : i32
    %c0_i32_1 = arith.constant 0 : i32
    %c0_i32_2 = arith.constant 0 : i32
    return %c0_i32, %c0_i32_0, %c0_i32_1 : i32, i32, i32
  }
  func.func @transform_5(%arg0: i32) -> (i32, i32, i32) {
    %c0_i32 = arith.constant 0 : i32
    %c0_i32_0 = arith.constant 0 : i32
    %c0_i32_1 = arith.constant 0 : i32
    %c0_i32_2 = arith.constant 0 : i32
    return %c0_i32, %c0_i32_0, %c0_i32_1 : i32, i32, i32
  }
  func.func @transform_6(%arg0: i32) -> (i32, i32, i32) {
    %c0_i32 = arith.constant 0 : i32
    %c0_i32_0 = arith.constant 0 : i32
    %c0_i32_1 = arith.constant 0 : i32
    %c0_i32_2 = arith.constant 0 : i32
    return %c0_i32, %c0_i32_0, %c0_i32_1 : i32, i32, i32
  }
  func.func @transform_7(%arg0: i32) -> (i32, i32, i32) {
    %c0_i32 = arith.constant 0 : i32
    %c0_i32_0 = arith.constant 0 : i32
    %c0_i32_1 = arith.constant 0 : i32
    %c0_i32_2 = arith.constant 0 : i32
    return %c0_i32, %c0_i32_0, %c0_i32_1 : i32, i32, i32
  }
  func.func @transform_8(%arg0: i32) -> (i32, i32, i32) {
    %c0_i32 = arith.constant 0 : i32
    %c0_i32_0 = arith.constant 0 : i32
    %c0_i32_1 = arith.constant 0 : i32
    %c0_i32_2 = arith.constant 0 : i32
    return %c0_i32, %c0_i32_0, %c0_i32_1 : i32, i32, i32
  }
  func.func @transform_9(%arg0: i32) -> (i32, i32, i32) {
    %c0_i32 = arith.constant 0 : i32
    %c0_i32_0 = arith.constant 0 : i32
    %c0_i32_1 = arith.constant 0 : i32
    %c0_i32_2 = arith.constant 0 : i32
    return %c0_i32, %c0_i32_0, %c0_i32_1 : i32, i32, i32
  }
  func.func @transform_10(%arg0: i32) -> (i32, i32, i32) {
    %c0_i32 = arith.constant 0 : i32
    %c0_i32_0 = arith.constant 0 : i32
    %c0_i32_1 = arith.constant 0 : i32
    %c0_i32_2 = arith.constant 0 : i32
    return %c0_i32, %c0_i32_0, %c0_i32_1 : i32, i32, i32
  }
  func.func @transform_11(%arg0: i32) -> (i32, i32, i32) {
    %c0_i32 = arith.constant 0 : i32
    %c0_i32_0 = arith.constant 0 : i32
    %c0_i32_1 = arith.constant 0 : i32
    %c0_i32_2 = arith.constant 0 : i32
    return %c0_i32, %c0_i32_0, %c0_i32_1 : i32, i32, i32
  }
  func.func @transform_12(%arg0: i32) -> (i32, i32) {
    %c0_i32 = arith.constant 0 : i32
    %c0_i32_0 = arith.constant 0 : i32
    %c0_i32_1 = arith.constant 0 : i32
    return %c0_i32, %c0_i32_0 : i32, i32
  }
  func.func @transform_13(%arg0: i32) -> (i32, i32) {
    %c0_i32 = arith.constant 0 : i32
    %c0_i32_0 = arith.constant 0 : i32
    %c0_i32_1 = arith.constant 0 : i32
    return %c0_i32, %c0_i32_0 : i32, i32
  }
  func.func @transform_14(%arg0: i32) -> (i32, i32, i32) {
    %c0_i32 = arith.constant 0 : i32
    %c0_i32_0 = arith.constant 0 : i32
    %c0_i32_1 = arith.constant 0 : i32
    %c0_i32_2 = arith.constant 0 : i32
    return %c0_i32, %c0_i32_0, %c0_i32_1 : i32, i32, i32
  }
  func.func @transform_15(%arg0: i32) -> (i32, i32, i32) {
    %c0_i32 = arith.constant 0 : i32
    %c0_i32_0 = arith.constant 0 : i32
    %c0_i32_1 = arith.constant 0 : i32
    %c0_i32_2 = arith.constant 0 : i32
    return %c0_i32, %c0_i32_0, %c0_i32_1 : i32, i32, i32
  }
  func.func @transform_16(%arg0: i32) -> (i32, i32) {
    %c0_i32 = arith.constant 0 : i32
    %c0_i32_0 = arith.constant 0 : i32
    %c0_i32_1 = arith.constant 0 : i32
    return %c0_i32, %c0_i32_0 : i32, i32
  }
  func.func @transform_17(%arg0: i32) -> (i32, i32) {
    %c0_i32 = arith.constant 0 : i32
    %c0_i32_0 = arith.constant 0 : i32
    %c0_i32_1 = arith.constant 0 : i32
    return %c0_i32, %c0_i32_0 : i32, i32
  }
  func.func @transform_18(%arg0: i32) -> (i32, i32) {
    %c0_i32 = arith.constant 0 : i32
    %c0_i32_0 = arith.constant 0 : i32
    return %arg0, %c0_i32 : i32, i32
  }
  func.func @transform_19(%arg0: i32) -> (i32, i32, i32) {
    %c0_i32 = arith.constant 0 : i32
    %c0_i32_0 = arith.constant 0 : i32
    %c0_i32_1 = arith.constant 0 : i32
    return %c0_i32, %arg0, %c0_i32_0 : i32, i32, i32
  }
}

</mosaic_0001>

<bundles_post_ra>
// kernel: tpu_custom_call.1
= control target key start
LH: loop header
LB: loop body
LE: loop exit
PB: predicated region body
PF: predicated region fallthrough
CT: control target
= control target key end

     0   :  { %s2074_s0 = inlined_call_operand.hbm [shape: f32[8,64], index: 0, kind: input, shape index: {}]   ;;  %s2075_s1 = inlined_call_operand.vmem [shape: f32[2,8,32], index: 1, kind: input, shape index: {}]   ;;  %s2076_s2 = inlined_call_operand.vmem [shape: bf16[64,32], index: 2, kind: input, shape index: {}]   ;;  %s2077_s3 = inlined_call_operand.hbm [shape: f32[1,32], index: 3, kind: input, shape index: {}]   ;;  %s2078_s4 = inlined_call_operand.vmem [shape: bf16[2,64,32], index: 4, kind: input, shape index: {}]   ;;  %s2079_s5 = inlined_call_operand.vmem [shape: bf16[2,64,32], index: 5, kind: input, shape index: {}]   ;;  %s2080_s6 = inlined_call_operand.vmem [shape: bf16[2,32,32], index: 6, kind: input, shape index: {}]   ;;  %s2081_s7 = inlined_call_operand.vmem [shape: bf16[2,32,32], index: 7, kind: input, shape index: {}]   ;;  %s2082_s8 = inlined_call_operand.vmem [shape: f32[2,1,32], index: 8, kind: input, shape index: {}]   ;;  %s2083_s9 = inlined_call_operand.vmem [shape: f32[2,1,32], index: 9, kind: input, shape index: {}]   ;;  %s2084_s10 = inlined_call_operand.vmem [shape: f32[2,1,32], index: 10, kind: input, shape index: {}]   ;;  %s2085_s11 = inlined_call_operand.vmem [shape: f32[2,1,32], index: 11, kind: input, shape index: {}]   ;;  %s2086_s12 = inlined_call_operand.vmem [shape: bf16[32,64], index: 12, kind: input, shape index: {}]   ;;  %s2087_s13 = inlined_call_operand.vmem [shape: f32[1,64], index: 13, kind: input, shape index: {}]   ;;  %s2088_s14 = inlined_call_operand.vmem [shape: bf16[2,64,64], index: 14, kind: input, shape index: {}]   ;;  %s2089_s15 = inlined_call_operand.vmem [shape: f32[2,1,64], index: 15, kind: input, shape index: {}]   ;;  %s2090_s16 = inlined_call_operand.vmem [shape: bf16[64,128], index: 16, kind: input, shape index: {}]   ;;  %s2091_s17 = inlined_call_operand.vmem [shape: f32[1,128], index: 17, kind: input, shape index: {}]   ;;  %s2092_s18 = inlined_call_operand.hbm [shape: f32[8,128], index: 18, kind: output, shape index: {0}]   ;;  %s2093_s19 = inlined_call_operand.hbm [shape: f32[2,8,32], index: 19, kind: output, shape index: {1}]  }
   0x1   :  { %2098 = sst [smem:[#allocation14_spill]] %s2074_s0 }
   0x2   :  { %2099 = sst [smem:[#allocation15_spill]] %s2075_s1 }
   0x3   :  { %2100 = sst [smem:[#allocation16_spill]] %s2076_s2 }
   0x4   :  { %2101 = sst [smem:[#allocation17_spill]] %s2077_s3 }
   0x5   :  { %25 = vsyncpa [#allocation3], 0 }
   0x6   :  { %26 = vsyncpa [#allocation6], 0 }
   0x7   :  { %27 = vsyncpa [#allocation4], 0 }
   0x8   :  { %28 = vsyncpa [#allocation9], 0  ;;  %s1650_s0 = smov [#allocation2]   ;;  %s1651_s20 = smov [#allocation5]  }
   0x9   :  { %s35_s30 = sshll.u32 %s1650_s0, 4  ;;  %s49_s21 = sshll.u32 %s1651_s20, 4  ;;  %s36_s30 = int_to_ptr.vmem [resolvable:$true] %s35_s30  ;;  %s50_s21 = int_to_ptr.vmem [resolvable:$true] %s49_s21 }
   0xa   :  { %s2102_s2 = sld [smem:[#allocation14_spill]] }
  0x10   :  { %s1554_s23 = scalar_lea.hbm %s2102_s2, 128 }
  0x11   :  { %p1555_p0 = scmp.ne.s32.totalorder %s2102_s2, %s1554_s23  ;;  %p1558_p1 = scmp.lt.u32.totalorder %s1554_s23, %s2102_s2 }
  0x13   :  { %p1560_p2 = pnand %p1558_p1, %p1555_p0 }
  0x15   :  { %1563 = shalt.err (!%p1560_p2)
}
  0x16   :  { %s1564_s27 = scalar_lea.vmem %s36_s30, 128  ;;  %p1569_p4 = scmp.lt.s32.totalorder %s36_s30, %s36_s30 }
  0x17   :  { %p1565_p3 = scmp.ne.s32.totalorder %s36_s30, %s1564_s27  ;;  %p1570_p5 = scmp.lt.s32.totalorder %s1564_s27, %s1564_s27 }
  0x19   :  { %p1571_p6 = por %p1570_p5, %p1569_p4 }
  0x1b   :  { %p1572_p7 = pnand %p1571_p6, %p1565_p3 }
  0x1d   :  { %1575 = shalt.err (!%p1572_p7)
}
  0x1e   :  { %38 = dma.hbm_to_vmem [thread:$0]  %s2102_s2, 128, %s36_s30, [#allocation3]  }
  0x1f   :  { %s2103_s1 = sld [smem:[#allocation17_spill]] }
  0x25   :  { %s1576_s22 = scalar_lea.hbm %s2103_s1, 16 }
  0x26   :  { %p1577_p8 = scmp.ne.s32.totalorder %s2103_s1, %s1576_s22  ;;  %p1580_p9 = scmp.lt.u32.totalorder %s1576_s22, %s2103_s1 }
  0x28   :  { %p1582_p10 = pnand %p1580_p9, %p1577_p8 }
  0x2a   :  { %1585 = shalt.err (!%p1582_p10)
}
  0x2b   :  { %s1586_s26 = scalar_lea.vmem %s50_s21, 16  ;;  %s1590_s27 = scalar_lea.vmem %s50_s21, 32 }
  0x2c   :  { %p1587_p11 = scmp.ne.s32.totalorder %s50_s21, %s1586_s26  ;;  %p1591_p12 = scmp.lt.s32.totalorder %s50_s21, %s50_s21 }
  0x2d   :  { %p1592_p13 = scmp.lt.s32.totalorder %s1590_s27, %s1586_s26 }
  0x2f   :  { %p1593_p0 = por %p1592_p13, %p1591_p12 }
  0x31   :  { %p1594_p1 = pnand %p1593_p0, %p1587_p11 }
  0x33   :  { %1597 = shalt.err (!%p1594_p1)
}
  0x34   :  { %52 = dma.hbm_to_vmem [thread:$0]  %s2103_s1, 16, %s50_s21, [#allocation6]  }
  0x35   :  { %1642 = dma.done.wait [#allocation3], 128  }
  0x36   :  { %1643 = vsyncadd [#allocation3], 4294967168 }
  0x37   :  { %1644 = dma.done.wait [#allocation6], 16  }
  0x38   :  { %1645 = vsyncadd [#allocation6], 4294967280  ;;  %v1652_v0 = vmov 0.0   ;;  %vm1653_vm0 = vmmov 0   ;;  %s2104_s0 = sld [smem:[#allocation16_spill]]  ;;  %s2105_s24 = sld [smem:[#allocation15_spill]] }
  0x39   :  { %1347 = vmatprep.subr.bf16.mxu0 %v1652_v0  ;;  %1355 = vmatprep.mubr.msk.bf16.mxu0 %vm1653_vm0, %v1652_v0  ;;  %s1654_s25 = smov 32   ;;  %v1496_v4 = vld [vmem:[%s2078_s4] sm:$0xff]   ;;  %v1498_v6 = vld [vmem:[%s2078_s4 + $0x8] sm:$0xff]   ;;  %vm129_vm1 = vcmask 523264   ;;  %v1500_v9 = vld [vmem:[%s2078_s4 + $0x10] sm:$0xff]   ;;  %vm180_vm2 = vcmask 261120  }
  0x3a   :  { %1359 = vmatprep.subr.bf16.mxu1 %v1652_v0  ;;  %1367 = vmatprep.mubr.msk.bf16.mxu1 %vm1653_vm0, %v1652_v0  ;;  %v88_v8 = vld [vmem:[#allocation2] sm:$0xff]  ;;  %v1499_v12 = vld [vmem:[%s2079_s5 + $0x8] sm:$0xff]   ;;  %v1501_v13 = vld [vmem:[%s2079_s5 + $0x10] sm:$0xff]  }
  0x3b   :  { %1360 = vmatpush3.bf16.msra.mxu1 %v1496_v4  ;;  %v1497_v10 = vld [vmem:[%s2079_s5] sm:$0xff]   ;;  %v89_v11 = vpack.c.bf16 %v88_v8, %v88_v8  ;;  %v1502_v14 = vld [vmem:[%s2078_s4 + $0x18] sm:$0xff]   ;;  %v1182_v17 = vld [vmem:[#allocation5] ss:$0 sm:$0xff] }
  0x3c   :  { %1361 = vmatprep.subr.bf16.mxu1 %v1652_v0  ;;  %v1503_v15 = vld [vmem:[%s2079_s5 + $0x18] sm:$0xff]   ;;  %v1504_v25 = vld [vmem:[%s2080_s6] sm:$0xff]   ;;  %v1505_v27 = vld [vmem:[%s2080_s6 + $0x8] sm:$0xff]  }
  0x3d   :  { %v1506_v28 = vld [vmem:[%s2081_s7] sm:$0xff]   ;;  %v1507_v30 = vld [vmem:[%s2081_s7 + $0x8] sm:$0xff]   ;;  %v1512_v36 = vld [vmem:[%s2078_s4 + $0x30] sm:$0xff]  }
  0x3e   :  { %v1492_v1 = vld [vmem:[%s2104_s0] sm:$0xff]   ;;  %v1493_v2 = vld [vmem:[%s2104_s0 + $0x8] sm:$0xff]   ;;  %v1494_v5 = vld [vmem:[%s2104_s0 + $0x10] sm:$0xff]  }
  0x3f   :  { %1348 = vmatpush3.bf16.msra.mxu0 %v1492_v1  ;;  %v1799_v3 = vld [vmem:[%s2105_s24] sm:$0xff]  ;;  %v1495_v7 = vld [vmem:[%s2104_s0 + $0x18] sm:$0xff]   ;;  %1362 = vmatpush3.bf16.msra.mxu1 %v1498_v6  ;;  %v1850_v16 = vld [vmem:[%s2105_s24 + $0x8] sm:$0xff] }
  0x40   :  { %1349 = vmatprep.subr.bf16.mxu0 %v1652_v0  ;;  %177 = vrot.lane.b32.xlu0 %v1799_v3, %s1654_s25  ;;  %v175_v31 = vpack.c.bf16 %v1799_v3, %v1799_v3  ;;  %v1508_v32 = vld [vmem:[%s2078_s4 + $0x20] sm:$0xff]   ;;  %v1510_v34 = vld [vmem:[%s2078_s4 + $0x28] sm:$0xff]   ;;  %v1513_v37 = vld [vmem:[%s2079_s5 + $0x30] sm:$0xff]  }
  0x41   :  { %1363 = vmatprep.subr.bf16.mxu1 %v1652_v0  ;;  %v1509_v33 = vld [vmem:[%s2079_s5 + $0x20] sm:$0xff]   ;;  %v1511_v35 = vld [vmem:[%s2079_s5 + $0x28] sm:$0xff]   ;;  %v1514_v38 = vld [vmem:[%s2078_s4 + $0x38] sm:$0xff]  }
  0x42   :  { %v1515_v39 = vld [vmem:[%s2079_s5 + $0x38] sm:$0xff]   ;;  %v1188_v40 = vld [vmem:[%s2082_s8] ss:$0 sm:$0xff] }
  0x43   :  { %1350 = vmatpush3.bf16.msra.mxu0 %v1493_v2  ;;  %1364 = vmatpush3.bf16.msra.mxu1 %v1500_v9  ;;  %v1195_v44 = vld [vmem:[%s2083_s9] ss:$0 sm:$0xff] }
  0x44   :  { %1351 = vmatprep.subr.bf16.mxu0 %v1652_v0  ;;  %1365 = vmatprep.subr.bf16.mxu1 %v1652_v0  ;;  %v1206_v2 = vld [vmem:[%s2085_s11] ss:$0 sm:$0xff] }
  0x45   :  { %501 = vrot.lane.b32.xlu0 %v1850_v16, %s1654_s25  ;;  %v1202_v6 = vld [vmem:[%s2084_s10] ss:$0 sm:$0xff] }
  0x47   :  { %1352 = vmatpush3.bf16.msra.mxu0 %v1494_v5  ;;  %1366 = vmatpush3.bf16.msra.mxu1 %v1502_v14 }
  0x48   :  { %1353 = vmatprep.subr.bf16.mxu0 %v1652_v0  ;;  %1383 = vmatprep.subr.bf16.mxu1 %v1652_v0 }
  0x4b   :  { %1354 = vmatpush3.bf16.msra.mxu0 %v1495_v7 }
  0x4c   :  { %1371 = vmatprep.subr.bf16.mxu0 %v1652_v0 }
  0x4e   :  { %1356 = vmatmul.mubr.msk.bf16.vlgmr.msra.gmra.mrb[0].mxu0 %vm129_vm1, %v89_v11 }
  0x4f   :  { %1372 = vmatpush3.bf16.msra.mxu0 %v1497_v10  ;;  %1379 = vmatprep.mubr.msk.bf16.mxu0 %vm1653_vm0, %v1652_v0 }
  0x50   :  { %1373 = vmatprep.subr.bf16.mxu0 %v1652_v0 }
  0x53   :  { %1374 = vmatpush3.bf16.msra.mxu0 %v1499_v12 }
  0x54   :  { %1375 = vmatprep.subr.bf16.mxu0 %v1652_v0 }
  0x57   :  { %1376 = vmatpush3.bf16.msra.mxu0 %v1501_v13 }
  0x58   :  { %1377 = vmatprep.subr.bf16.mxu0 %v1652_v0 }
  0x5b   :  { %1378 = vmatpush3.bf16.msra.mxu0 %v1503_v15 }
  0x5c   :  { %1399 = vmatprep.subr.bf16.mxu0 %v1652_v0 }
  0xb2   :  { %v178_v19 = vpop.permute.xlu0 %177 }
 0x121   :  { %v167_v18 = vpop.f32.mrb[0].mxu0 }
 0x122   :  { %v168_v20 = vadd.f32 %v1182_v17, %v167_v18  ;;  %v1357_v21 = vpop.f32.mrb[1].mxu0  ;;  %v502_v17 = vpop.permute.xlu0 %501 }
 0x123   :  { %v170_v22 = vpop.f32.mrb[2].mxu0 }
 0x124   :  { %v181_v23 = vsel %vm180_vm2, %v168_v20, %v178_v19  ;;  %v1358_v24 = vpop.f32.mrb[3].mxu0  ;;  %v174_v29 = vpack.c.bf16 %v168_v20, %v168_v20  ;;  %v1516_v20 = vld [vmem:[%s2080_s6 + $0x10] sm:$0xff]  }
 0x125   :  { %v182_v26 = vpack.c.bf16 %v181_v23, %v181_v23  ;;  %v1518_v22 = vld [vmem:[%s2081_s7 + $0x10] sm:$0xff]   ;;  %v1519_v23 = vld [vmem:[%s2081_s7 + $0x18] sm:$0xff]   ;;  %v499_v24 = vpack.c.bf16 %v1850_v16, %v1850_v16 }
 0x127   :  { %1368 = vmatmul.mubr.msk.bf16.vlgmr.msra.gmra.mrb[0].mxu1 %vm129_vm1, %v182_v26  ;;  %1380 = vmatmul.mubr.msk.bf16.vlgmr.msra.gmra.mrb[4].mxu0 %vm129_vm1, %v182_v26  ;;  %v1520_v26 = vld [vmem:[%s2086_s12] sm:$0xff]  }
 0x128   :  { %1384 = vmatpush3.bf16.msra.mxu1 %v1504_v25  ;;  %1387 = vmatprep.mubr.msk.bf16.mxu1 %vm1653_vm0, %v1652_v0 }
 0x129   :  { %1385 = vmatprep.subr.bf16.mxu1 %v1652_v0  ;;  %1407 = vmatprep.mubr.msk.bf16.mxu0 %vm1653_vm0, %v1652_v0 }
 0x12a   :  { %1400 = vmatpush3.bf16.msra.mxu0 %v1508_v32 }
 0x12b   :  { %1401 = vmatprep.subr.bf16.mxu0 %v1652_v0 }
 0x12c   :  { %1386 = vmatpush3.bf16.msra.mxu1 %v1505_v27  ;;  %v1521_v27 = vld [vmem:[%s2086_s12 + $0x8] sm:$0xff]  }
 0x12d   :  { %1391 = vmatprep.subr.bf16.mxu1 %v1652_v0 }
 0x12e   :  { %1402 = vmatpush3.bf16.msra.mxu0 %v1510_v34  ;;  %v1236_v34 = vld [vmem:[%s2083_s9 + $0x1] ss:$0 sm:$0xff] }
 0x12f   :  { %1388 = vmatmul.mubr.msk.bf16.vlgmr.msra.gmra.mrb[4].mxu1 %vm180_vm2, %v174_v29  ;;  %1403 = vmatprep.subr.bf16.mxu0 %v1652_v0  ;;  %v1523_v29 = vld [vmem:[%s2088_s14 + $0x8] sm:$0xff]  }
 0x130   :  { %1392 = vmatpush3.bf16.msra.mxu1 %v1506_v28  ;;  %1395 = vmatprep.mubr.msk.bf16.mxu1 %vm1653_vm0, %v1652_v0  ;;  %v1522_v28 = vld [vmem:[%s2088_s14] sm:$0xff]  }
 0x131   :  { %1393 = vmatprep.subr.bf16.mxu1 %v1652_v0 }
 0x132   :  { %1404 = vmatpush3.bf16.msra.mxu0 %v1512_v36 }
 0x133   :  { %1405 = vmatprep.subr.bf16.mxu0 %v1652_v0 }
 0x134   :  { %1394 = vmatpush3.bf16.msra.mxu1 %v1507_v30  ;;  %v1220_v30 = vld [vmem:[%s2082_s8 + $0x1] ss:$0 sm:$0xff] }
 0x135   :  { %1411 = vmatprep.subr.bf16.mxu1 %v1652_v0 }
 0x136   :  { %1406 = vmatpush3.bf16.msra.mxu0 %v1514_v38 }
 0x137   :  { %1396 = vmatmul.mubr.msk.bf16.vlgmr.msra.gmra.mrb[8].mxu1 %vm180_vm2, %v175_v31  ;;  %1423 = vmatprep.subr.bf16.mxu0 %v1652_v0 }
 0x138   :  { %1419 = vmatprep.mubr.msk.bf16.mxu1 %vm1653_vm0, %v1652_v0  ;;  %1412 = vmatpush3.bf16.msra.mxu1 %v1509_v33 }
 0x139   :  { %1413 = vmatprep.subr.bf16.mxu1 %v1652_v0 }
 0x13c   :  { %1414 = vmatpush3.bf16.msra.mxu1 %v1511_v35 }
 0x13d   :  { %1415 = vmatprep.subr.bf16.mxu1 %v1652_v0 }
 0x140   :  { %1416 = vmatpush3.bf16.msra.mxu1 %v1513_v37 }
 0x141   :  { %1417 = vmatprep.subr.bf16.mxu1 %v1652_v0 }
 0x144   :  { %1418 = vmatpush3.bf16.msra.mxu1 %v1515_v39 }
 0x145   :  { %1431 = vmatprep.subr.bf16.mxu1 %v1652_v0 }
 0x1fa   :  { %v259_v41 = vpop.f32.mrb[0].mxu1  ;;  %v344_v42 = vpop.f32.mrb[4].mxu0 }
 0x1fb   :  { %v260_v43 = vadd.f32 %v1188_v40, %v259_v41  ;;  %v1369_v45 = vpop.f32.mrb[1].mxu1  ;;  %v1381_v46 = vpop.f32.mrb[5].mxu0  ;;  %v345_v52 = vadd.f32 %v1195_v44, %v344_v42 }
 0x1fc   :  { %v262_v47 = vpop.f32.mrb[2].mxu1  ;;  %v347_v48 = vpop.f32.mrb[6].mxu0 }
 0x1fd   :  { %v1194_v49 = vmul.f32 -1.442695, %v260_v43  ;;  %v1370_v50 = vpop.f32.mrb[3].mxu1  ;;  %v1382_v51 = vpop.f32.mrb[7].mxu0  ;;  %v1201_v53 = vmul.f32 -1.442695, %v345_v52 }
 0x1ff   :  { %1534 = vpow2.f32 %v1194_v49 }
 0x200   :  { %1536 = vpow2.f32 %v1201_v53 }
 0x202   :  { %v416_v54 = vpop.f32.mrb[4].mxu1 }
 0x203   :  { %v1389_v55 = vpop.f32.mrb[5].mxu1  ;;  %v417_v8 = vadd.f32 %v1202_v6, %v416_v54 }
 0x204   :  { %v419_v56 = vpop.f32.mrb[6].mxu1  ;;  %v1257_v55 = vld [vmem:[%s2085_s11 + $0x1] ss:$0 sm:$0xff] }
 0x205   :  { %v1390_v57 = vpop.f32.mrb[7].mxu1 }
 0x209   :  { %v1535_v58 = vpop.eup %1534 }
 0x20a   :  { %v268_v59 = vadd.f32 1.0, %v1535_v58  ;;  %v482_v60 = vpop.f32.mrb[8].mxu1  ;;  %v1537_v1 = vpop.eup %1536  ;;  %v1248_v58 = vld [vmem:[%s2084_s10 + $0x1] ss:$0 sm:$0xff]  ;;  %s1655_s10 = smov [#allocation8]  }
 0x20b   :  { %v1397_v61 = vpop.f32.mrb[9].mxu1  ;;  %v353_v4 = vadd.f32 1.0, %v1537_v1  ;;  %v483_v5 = vadd.f32 %v1206_v2, %v482_v60  ;;  %s1165_s11 = sshll.u32 %s1655_s10, 4  ;;  %s1166_s11 = int_to_ptr.vmem [resolvable:$true] %s1165_s11 }
 0x20c   :  { %1538 = vrcp.f32 %v268_v59  ;;  %v485_v62 = vpop.f32.mrb[10].mxu1  ;;  %s1598_s24 = scalar_lea.vmem %s1166_s11, 256  ;;  %p1603_p3 = scmp.lt.s32.totalorder %s1166_s11, %s1166_s11 }
 0x20d   :  { %v1398_v63 = vpop.f32.mrb[11].mxu1  ;;  %1540 = vrcp.f32 %v353_v4  ;;  %p1599_p2 = scmp.ne.s32.totalorder %s1166_s11, %s1598_s24  ;;  %p1604_p4 = scmp.lt.s32.totalorder %s1598_s24, %s1598_s24 }
 0x20f   :  { %p1605_p5 = por %p1604_p4, %p1603_p3 }
 0x211   :  { %p1606_p6 = pnand %p1605_p5, %p1599_p2 }
 0x216   :  { %v1539_v7 = vpop.eup %1538 }
 0x217   :  { %v488_v9 = vmul.f32 %v1539_v7, %v483_v5  ;;  %v1541_v11 = vpop.eup %1540 }
 0x218   :  { %v491_v12 = vsub.f32 1.0, %v1541_v11  ;;  %v493_v15 = vmul.f32 %v1541_v11, %v1799_v3  ;;  %v1517_v3 = vld [vmem:[%s2080_s6 + $0x18] sm:$0xff]   ;;  %v1261_v11 = vld [vmem:[%s2087_s13] ss:$0 sm:$0xff] }
 0x219   :  { %v489_v10 = vadd.f32 %v488_v9, %v417_v8  ;;  %v1524_v8 = vld [vmem:[%s2088_s14 + $0x10] sm:$0xff]   ;;  %v1526_v9 = vld [vmem:[%s2088_s14 + $0x20] sm:$0xff]  }
 0x21b   :  { %1542 = vtanh.f32 %v489_v10  ;;  %v1527_v10 = vld [vmem:[%s2088_s14 + $0x28] sm:$0xff]  }
 0x225   :  { %v1543_v13 = vpop.eup %1542 }
 0x226   :  { %v492_v14 = vmul.f32 %v1543_v13, %v491_v12 }
 0x228   :  { %v494_v18 = vadd.f32 %v493_v15, %v492_v14 }
 0x22a   :  { %v504_v19 = vsel %vm180_vm2, %v494_v18, %v502_v17  ;;  %495 = vst.msk [vmem:[#allocation8] sm:$0xff] %vm180_vm2, %v494_v18  ;;  %v498_v25 = vpack.c.bf16 %v494_v18, %v494_v18 }
 0x22b   :  { %v505_v21 = vpack.c.bf16 %v504_v19, %v504_v19 }
 0x22d   :  { %1408 = vmatmul.mubr.msk.bf16.vlgmr.msra.gmra.mrb[8].mxu0 %vm129_vm1, %v505_v21  ;;  %1420 = vmatmul.mubr.msk.bf16.vlgmr.msra.gmra.mrb[12].mxu1 %vm129_vm1, %v505_v21  ;;  %v1529_v21 = vld [vmem:[%s2088_s14 + $0x38] sm:$0xff]  }
 0x22e   :  { %1424 = vmatpush3.bf16.msra.mxu0 %v1516_v20  ;;  %1427 = vmatprep.mubr.msk.bf16.mxu0 %vm1653_vm0, %v1652_v0  ;;  %v1528_v20 = vld [vmem:[%s2088_s14 + $0x30] sm:$0xff]  }
 0x22f   :  { %1425 = vmatprep.subr.bf16.mxu0 %v1652_v0  ;;  %1432 = vmatpush3.bf16.msra.mxu1 %v1518_v22  ;;  %v1530_v22 = vld [vmem:[%s2090_s16] sm:$0xff]  }
 0x230   :  { %1433 = vmatprep.subr.bf16.mxu1 %v1652_v0  ;;  %1435 = vmatprep.mubr.msk.bf16.mxu1 %vm1653_vm0, %v1652_v0 }
 0x232   :  { %1426 = vmatpush3.bf16.msra.mxu0 %v1517_v3  ;;  %v1531_v3 = vld [vmem:[%s2090_s16 + $0x8] sm:$0xff]  }
 0x233   :  { %1434 = vmatpush3.bf16.msra.mxu1 %v1519_v23  ;;  %1439 = vmatprep.subr.bf16.mxu0 %v1652_v0  ;;  %v1265_v23 = vld [vmem:[%s2089_s15] ss:$0 sm:$0xff] }
 0x234   :  { %1447 = vmatprep.subr.bf16.mxu1 %v1652_v0 }
 0x235   :  { %1428 = vmatmul.mubr.msk.bf16.vlgmr.msra.gmra.mrb[12].mxu0 %vm180_vm2, %v498_v25 }
 0x236   :  { %1436 = vmatmul.mubr.msk.bf16.vlgmr.msra.gmra.mrb[16].mxu1 %vm180_vm2, %v499_v24  ;;  %1443 = vmatprep.mubr.msk.bf16.mxu0 %vm1653_vm0, %v1652_v0 }
 0x237   :  { %1455 = vmatprep.mubr.msk.bf16.mxu1 %vm1653_vm0, %v1652_v0  ;;  %1440 = vmatpush3.bf16.msra.mxu0 %v1520_v26 }
 0x238   :  { %1441 = vmatprep.subr.bf16.mxu0 %v1652_v0  ;;  %1448 = vmatpush3.bf16.msra.mxu1 %v1522_v28 }
 0x239   :  { %1449 = vmatprep.subr.bf16.mxu1 %v1652_v0 }
 0x23b   :  { %1442 = vmatpush3.bf16.msra.mxu0 %v1521_v27 }
 0x23c   :  { %1459 = vmatprep.subr.bf16.mxu0 %v1652_v0  ;;  %1450 = vmatpush3.bf16.msra.mxu1 %v1523_v29 }
 0x23d   :  { %1451 = vmatprep.subr.bf16.mxu1 %v1652_v0 }
 0x240   :  { %1452 = vmatpush3.bf16.msra.mxu1 %v1524_v8 }
 0x241   :  { %1453 = vmatprep.subr.bf16.mxu1 %v1652_v0 }
 0x300   :  { %v584_v31 = vpop.f32.mrb[8].mxu0  ;;  %v671_v32 = vpop.f32.mrb[12].mxu1 }
 0x301   :  { %v585_v33 = vadd.f32 %v1220_v30, %v584_v31  ;;  %v1409_v35 = vpop.f32.mrb[9].mxu0  ;;  %v1421_v36 = vpop.f32.mrb[13].mxu1  ;;  %v672_v42 = vadd.f32 %v1236_v34, %v671_v32  ;;  %v1532_v31 = vld [vmem:[%s2090_s16 + $0x10] sm:$0xff]   ;;  %v1533_v32 = vld [vmem:[%s2090_s16 + $0x18] sm:$0xff]  }
 0x302   :  { %v587_v37 = vpop.f32.mrb[10].mxu0  ;;  %v674_v38 = vpop.f32.mrb[14].mxu1 }
 0x303   :  { %v1226_v39 = vmul.f32 -1.442695, %v585_v33  ;;  %v1410_v40 = vpop.f32.mrb[11].mxu0  ;;  %v1422_v41 = vpop.f32.mrb[15].mxu1  ;;  %v1242_v43 = vmul.f32 -1.442695, %v672_v42 }
 0x304   :  { %v1280_v33 = vld [vmem:[%s2089_s15 + $0x1] ss:$0 sm:$0xff] }
 0x305   :  { %1544 = vpow2.f32 %v1226_v39 }
 0x306   :  { %1546 = vpow2.f32 %v1242_v43 }
 0x308   :  { %v745_v44 = vpop.f32.mrb[12].mxu0 }
 0x309   :  { %v1429_v45 = vpop.f32.mrb[13].mxu0  ;;  %v813_v46 = vpop.f32.mrb[16].mxu1  ;;  %v746_v60 = vadd.f32 %v1248_v58, %v745_v44 }
 0x30a   :  { %v748_v47 = vpop.f32.mrb[14].mxu0  ;;  %v1437_v48 = vpop.f32.mrb[17].mxu1  ;;  %v814_v57 = vadd.f32 %v1257_v55, %v813_v46 }
 0x30b   :  { %v1430_v49 = vpop.f32.mrb[15].mxu0  ;;  %v816_v50 = vpop.f32.mrb[18].mxu1 }
 0x30c   :  { %v1438_v51 = vpop.f32.mrb[19].mxu1 }
 0x30f   :  { %v1545_v52 = vpop.eup %1544 }
 0x310   :  { %v593_v53 = vadd.f32 1.0, %v1545_v52  ;;  %v1547_v54 = vpop.eup %1546 }
 0x311   :  { %v680_v56 = vadd.f32 1.0, %v1547_v54 }
 0x312   :  { %1548 = vrcp.f32 %v593_v53 }
 0x313   :  { %1550 = vrcp.f32 %v680_v56 }
 0x31c   :  { %v1549_v59 = vpop.eup %1548 }
 0x31d   :  { %v819_v61 = vmul.f32 %v1549_v59, %v814_v57  ;;  %v1551_v63 = vpop.eup %1550 }
 0x31e   :  { %v822_v1 = vsub.f32 1.0, %v1551_v63  ;;  %v824_v4 = vmul.f32 %v1551_v63, %v1850_v16  ;;  %v1525_v16 = vld [vmem:[%s2088_s14 + $0x18] sm:$0xff]  }
 0x31f   :  { %v820_v62 = vadd.f32 %v819_v61, %v746_v60  ;;  %1454 = vmatpush3.bf16.msra.mxu1 %v1525_v16 }
 0x320   :  { %1471 = vmatprep.subr.bf16.mxu1 %v1652_v0 }
 0x321   :  { %1552 = vtanh.f32 %v820_v62 }
 0x32b   :  { %v1553_v2 = vpop.eup %1552 }
 0x32c   :  { %v823_v5 = vmul.f32 %v1553_v2, %v822_v1 }
 0x32e   :  { %v825_v6 = vadd.f32 %v824_v4, %v823_v5 }
 0x330   :  { %v828_v7 = vpack.c.bf16 %v825_v6, %v825_v6  ;;  %827 = vst.msk [vmem:[#allocation8 + $0x8] sm:$0xff] %vm180_vm2, %v825_v6 }
 0x332   :  { %1444 = vmatmul.mubr.msk.bf16.vlgmr.msra.gmra.mrb[16].mxu0 %vm180_vm2, %v828_v7 }
 0x333   :  { %1467 = vmatprep.mubr.msk.bf16.mxu0 %vm1653_vm0, %v1652_v0  ;;  %1460 = vmatpush3.bf16.msra.mxu0 %v1526_v9 }
 0x334   :  { %1461 = vmatprep.subr.bf16.mxu0 %v1652_v0 }
 0x337   :  { %1462 = vmatpush3.bf16.msra.mxu0 %v1527_v10 }
 0x338   :  { %1463 = vmatprep.subr.bf16.mxu0 %v1652_v0 }
 0x33b   :  { %1464 = vmatpush3.bf16.msra.mxu0 %v1528_v20 }
 0x33c   :  { %1465 = vmatprep.subr.bf16.mxu0 %v1652_v0 }
 0x33f   :  { %1466 = vmatpush3.bf16.msra.mxu0 %v1529_v21 }
 0x405   :  { %v889_v12 = vpop.f32.mrb[16].mxu0 }
 0x406   :  { %v890_v13 = vadd.f32 %v1261_v11, %v889_v12  ;;  %v1445_v14 = vpop.f32.mrb[17].mxu0 }
 0x407   :  { %v892_v15 = vpop.f32.mrb[18].mxu0 }
 0x408   :  { %v895_v17 = vmax.f32 %v890_v13, 0.0  ;;  %v1446_v18 = vpop.f32.mrb[19].mxu0 }
 0x40a   :  { %v896_v19 = vpack.c.bf16 %v895_v17, %v895_v17 }
 0x40c   :  { %1456 = vmatmul.mubr.msk.bf16.vlgmr.msra.gmra.mrb[20].mxu1 %vm129_vm1, %v896_v19 }
 0x40d   :  { %1479 = vmatprep.mubr.msk.bf16.mxu1 %vm1653_vm0, %v1652_v0  ;;  %1472 = vmatpush3.bf16.msra.mxu1 %v1530_v22 }
 0x40e   :  { %1473 = vmatprep.subr.bf16.mxu1 %v1652_v0 }
 0x411   :  { %1474 = vmatpush3.bf16.msra.mxu1 %v1531_v3 }
 0x412   :  { %1475 = vmatprep.subr.bf16.mxu1 %v1652_v0 }
 0x415   :  { %1476 = vmatpush3.bf16.msra.mxu1 %v1532_v31 }
 0x416   :  { %1477 = vmatprep.subr.bf16.mxu1 %v1652_v0 }
 0x419   :  { %1478 = vmatpush3.bf16.msra.mxu1 %v1533_v32 }
 0x4df   :  { %v973_v24 = vpop.f32.mrb[20].mxu1 }
 0x4e0   :  { %v974_v25 = vadd.f32 %v1265_v23, %v973_v24  ;;  %v1457_v26 = vpop.f32.mrb[21].mxu1 }
 0x4e1   :  { %v976_v27 = vpop.f32.mrb[22].mxu1 }
 0x4e2   :  { %v979_v28 = vmax.f32 %v974_v25, 0.0  ;;  %v1458_v29 = vpop.f32.mrb[23].mxu1 }
 0x4e4   :  { %v980_v30 = vpack.c.bf16 %v979_v28, %v979_v28 }
 0x4e6   :  { %1468 = vmatmul.mubr.msk.bf16.vlgmr.msra.gmra.mrb[20].mxu0 %vm129_vm1, %v980_v30 }
 0x5b9   :  { %v1059_v34 = vpop.f32.mrb[20].mxu0 }
 0x5ba   :  { %v1060_v35 = vadd.f32 %v1280_v33, %v1059_v34  ;;  %v1469_v36 = vpop.f32.mrb[21].mxu0 }
 0x5bb   :  { %v1062_v37 = vpop.f32.mrb[22].mxu0 }
 0x5bc   :  { %v1065_v38 = vmax.f32 %v1060_v35, 0.0  ;;  %v1470_v39 = vpop.f32.mrb[23].mxu0 }
 0x5be   :  { %v1066_v40 = vpack.c.bf16 %v1065_v38, %v1065_v38 }
 0x5c0   :  { %1480 = vmatmul.mubr.msk.bf16.vlgmr.msra.gmra.mrb[24].mxu1 %vm129_vm1, %v1066_v40 }
 0x5c1   :  { %1609 = shalt.err (!%p1606_p6)
}
 0x5c2   :  { %s1610_s25 = scalar_lea.hbm %s2093_s19, 256 }
 0x5c3   :  { %p1611_p7 = scmp.ne.s32.totalorder %s2093_s19, %s1610_s25  ;;  %p1614_p8 = scmp.lt.u32.totalorder %s1610_s25, %s2093_s19 }
 0x5c5   :  { %p1616_p9 = pnand %p1614_p8, %p1611_p7 }
 0x5c7   :  { %1619 = shalt.err (!%p1616_p9)
}
 0x5c8   :  { %s1656_s6 = smov 128   ;;  %s1657_s7 = smov 8   ;;  %v1286_v0 = vld [vmem:[%s2091_s17] ss:$0 sm:$0xff] }
 0x5c9   :  { %1171 = dma.vmem_to_hbm [thread:$0]  %s1166_s11, 256, %s2093_s19, [#allocation9], %s1656_s6, %s1656_s6, %s1657_s7  }
 0x5ca   :  { %s1658_s2 = smov [#allocation7]  }
 0x5cb   :  { %s1156_s28 = sshll.u32 %s1658_s2, 4  ;;  %s1157_s28 = int_to_ptr.vmem [resolvable:$true] %s1156_s28 }
 0x5cc   :  { %s1620_s4 = scalar_lea.vmem %s1157_s28, 128  ;;  %p1625_p11 = scmp.lt.s32.totalorder %s1157_s28, %s1157_s28 }
 0x5cd   :  { %p1621_p10 = scmp.ne.s32.totalorder %s1157_s28, %s1620_s4  ;;  %p1626_p12 = scmp.lt.s32.totalorder %s1620_s4, %s1620_s4 }
 0x5cf   :  { %p1627_p13 = por %p1626_p12, %p1625_p11 }
 0x5d1   :  { %p1628_p0 = pnand %p1627_p13, %p1621_p10 }
 0x693   :  { %v1143_v41 = vpop.f32.mrb[24].mxu1 }
 0x694   :  { %v1144_v42 = vadd.f32 %v1286_v0, %v1143_v41  ;;  %v1481_v43 = vpop.f32.mrb[25].mxu1 }
 0x695   :  { %v1146_v44 = vpop.f32.mrb[26].mxu1 }
 0x696   :  { %1149 = vst [vmem:[#allocation7] sm:$0xff] %v1144_v42  ;;  %v1482_v45 = vpop.f32.mrb[27].mxu1 }
 0x697   :  { %1631 = shalt.err (!%p1628_p0)
}
 0x698   :  { %s1632_s17 = scalar_lea.hbm %s2092_s18, 128 }
 0x699   :  { %p1633_p1 = scmp.ne.s32.totalorder %s2092_s18, %s1632_s17  ;;  %p1636_p2 = scmp.lt.u32.totalorder %s1632_s17, %s2092_s18 }
 0x69b   :  { %p1638_p3 = pnand %p1636_p2, %p1633_p1 }
 0x69d   :  { %1641 = shalt.err (!%p1638_p3)
}
 0x69e   :  { %1159 = dma.vmem_to_hbm [thread:$0]  %s1157_s28, 128, %s2092_s18, [#allocation4]  }
 0x69f   :  { %1646 = dma.done.wait [#allocation4], 128  }
 0x6a0   :  { %1647 = vsyncadd [#allocation4], 4294967168 }
 0x6a1   :  { %1648 = dma.done.wait [#allocation9], 256  }
 0x6a2   :  { %1649 = vsyncadd [#allocation9], 4294967040 }
 0x6a3   :  { %1178 = vsyncpa [#allocation3], 1 }
 0x6a4   :  { %1179 = vsyncpa [#allocation6], 1 }
 0x6a5   :  { %1180 = vsyncpa [#allocation4], 1 }
 0x6a6   :  { %1181 = vsyncpa [#allocation9], 1 }

</bundles_post_ra>
